<compile_context>
chip_gen: v7x
topology: tpu7x:2x2x1
jax: 0.10.0
libtpu: 0.0.40
codegen_flags: <defaults>
</compile_context>

<pallas_src>
import jax
import jax.numpy as jnp
from jax.experimental import pallas as pl
from jax.experimental.pallas import tpu as pltpu

_OUT_W = 8  # packed output columns: 0=value, 1=logp, 2=action(float), rest 0


def _policy_kernel(x_ref, w1_ref, w2_ref, wh_ref, b_ref, out_ref):
    h2w = w1_ref.shape[1]   # 2 * hidden_size
    haw = wh_ref.shape[1]   # 1 + num_actions

    # f32 in HBM -> bf16 for the MXU, cast on the VPU in-kernel (no extra
    # wrapper-side convert pass over HBM).
    x = x_ref[...].astype(w1_ref.dtype)     # bf16 [tb, num_inputs]
    b1 = b_ref[0:1, :h2w]                   # f32  [1, 2H]
    b2 = b_ref[1:2, :h2w]                   # f32  [1, 2H]
    bh = b_ref[2:3, :haw]                   # f32  [1, 1+A]

    # ---- fused layer 1 (critic|actor side by side), MXU + f32 accumulate ----
    h1 = jnp.dot(x, w1_ref[...], preferred_element_type=jnp.float32) + b1
    h1 = jnp.maximum(h1, 0.0)

    # ---- fused layer 2 (block-diagonal), single 2H-wide MXU pass ----
    h2 = jnp.dot(h1.astype(w2_ref.dtype), w2_ref[...],
                 preferred_element_type=jnp.float32) + b2
    h2 = jnp.maximum(h2, 0.0)

    # ---- fused heads: col 0 = value, cols 1.. = logits ----
    head = jnp.dot(h2.astype(wh_ref.dtype), wh_ref[...],
                   preferred_element_type=jnp.float32) + bh
    value = head[:, 0:1]
    logits = head[:, 1:haw]

    # ---- stable log-softmax pieces (exp on EUP, reduce on XLU) ----
    m = jnp.max(logits, axis=-1, keepdims=True)
    z = logits - m
    lse = jnp.log(jnp.sum(jnp.exp(z), axis=-1, keepdims=True))
    # log_prob of the argmax action: shifted logit at the argmax is exactly 0.
    logp = -lse

    # ---- deterministic action = argmax(logits) (first index on ties) ----
    num_actions = logits.shape[-1]
    col = jax.lax.broadcasted_iota(jnp.int32, logits.shape, 1)
    is_max = logits == m
    action = jnp.min(jnp.where(is_max, col, num_actions), axis=-1, keepdims=True)
    action = jnp.minimum(action, num_actions - 1)   # guard (keeps index in range)
    action_f = action.astype(jnp.float32)

    # ---- assemble the single packed output slab [tb, 8] ----
    oc = jax.lax.broadcasted_iota(jnp.int32, out_ref.shape, 1)
    out = jnp.where(oc == 0, value,
          jnp.where(oc == 1, logp,
          jnp.where(oc == 2, action_f, 0.0)))
    out_ref[...] = out


def _orthogonal(key, shape, gain):
    init = jax.nn.initializers.orthogonal(scale=gain)
    return init(key, shape, jnp.float32)


def make_policy_params(num_inputs, hidden_size, num_actions, key):
    """Mirror of the PyTorch init_ scheme. Weights are [in, out], biases [1, out]."""
    g2 = float(jnp.sqrt(2.0))
    keys = jax.random.split(key, 6)
    return dict(
        wc1=_orthogonal(keys[0], (num_inputs, hidden_size), g2),
        bc1=jnp.zeros((1, hidden_size), jnp.float32),
        wc2=_orthogonal(keys[1], (hidden_size, hidden_size), g2),
        bc2=jnp.zeros((1, hidden_size), jnp.float32),
        wv=_orthogonal(keys[2], (hidden_size, 1), 1.0),
        bv=jnp.zeros((1, 1), jnp.float32),
        wa1=_orthogonal(keys[3], (num_inputs, hidden_size), g2),
        ba1=jnp.zeros((1, hidden_size), jnp.float32),
        wa2=_orthogonal(keys[4], (hidden_size, hidden_size), g2),
        ba2=jnp.zeros((1, hidden_size), jnp.float32),
        wd=_orthogonal(keys[5], (hidden_size, num_actions), 1.0),
        bd=jnp.zeros((1, num_actions), jnp.float32),
    )


def fuse_policy_params(params, compute_dtype=jnp.bfloat16):
    """Wrapper-side fusion: 3 lane-full weight matrices + one packed bias slab."""
    hidden = params["wc2"].shape[0]
    num_actions = params["wd"].shape[1]

    w1 = jnp.concatenate([params["wc1"], params["wa1"]], axis=1)          # [I, 2H]
    b1 = jnp.concatenate([params["bc1"], params["ba1"]], axis=1)          # [1, 2H]

    zhh = jnp.zeros((hidden, hidden), jnp.float32)
    w2 = jnp.block([[params["wc2"], zhh], [zhh, params["wa2"]]])          # [2H, 2H]
    b2 = jnp.concatenate([params["bc2"], params["ba2"]], axis=1)          # [1, 2H]

    wh = jnp.concatenate([
        jnp.concatenate([params["wv"],
                         jnp.zeros((hidden, num_actions), jnp.float32)], axis=1),
        jnp.concatenate([jnp.zeros((hidden, 1), jnp.float32),
                         params["wd"]], axis=1),
    ], axis=0)                                                            # [2H, 1+A]
    bh = jnp.concatenate([params["bv"], params["bd"]], axis=1)            # [1, 1+A]

    pad_w = max(2 * hidden, 1 + num_actions)
    _pad = lambda b: jnp.pad(b, ((0, 0), (0, pad_w - b.shape[1])))
    biases = jnp.concatenate([_pad(b1), _pad(b2), _pad(bh)], axis=0)      # f32 [3, P]

    return dict(
        w1=w1.astype(compute_dtype),
        w2=w2.astype(compute_dtype),
        wh=wh.astype(compute_dtype),
        biases=biases,
    )


def _round_up(n, m):
    return ((n + m - 1) // m) * m


def _pick_tile_b(batch_padded):
    # Weights + per-tile activations are tiny, so use the largest batch tile
    # that divides the padded batch (amortizes the ~0.35us per-grid-step cost).
    for t in (2048, 1024, 512, 256, 128, 64, 32, 16, 8):
        if batch_padded % t == 0:
            return t
    return batch_padded


@jax.jit
def policy_act(fused, inputs, rnn_hxs, masks):
    """Equivalent of Policy.act(inputs, rnn_hxs, masks, deterministic=True)."""
    batch, num_inputs = inputs.shape
    w1, w2, wh, biases = fused["w1"], fused["w2"], fused["wh"], fused["biases"]

    # Pad the batch to a sublane multiple so any batch size gets a legal tile.
    batch_padded = _round_up(batch, 8)
    x = inputs
    if batch_padded != batch:
        x = jnp.pad(x, ((0, batch_padded - batch), (0, 0)))

    tile_b = _pick_tile_b(batch_padded)
    grid = (batch_padded // tile_b,)

    # Weights / biases resident in VMEM across all grid steps.
    resident = lambda shape: pl.BlockSpec(shape, lambda i: (0, 0))

    out = pl.pallas_call(
        _policy_kernel,
        out_shape=jax.ShapeDtypeStruct((batch_padded, _OUT_W), jnp.float32),
        grid=grid,
        in_specs=[
            pl.BlockSpec((tile_b, num_inputs), lambda i: (i, 0)),
            resident(w1.shape),
            resident(w2.shape),
            resident(wh.shape),
            resident(biases.shape),
        ],
        out_specs=pl.BlockSpec((tile_b, _OUT_W), lambda i: (i, 0)),
        compiler_params=pltpu.CompilerParams(
            dimension_semantics=("parallel",)),
    )(x, w1, w2, wh, biases)

    out = out[:batch]
    value = out[:, 0:1]
    logp = out[:, 1:2]
    action = out[:, 2:3].astype(jnp.int32)   # small ints: float round-trip is exact
    # Non-recurrent base: rnn_hxs (and masks) are untouched.
    return value, action, logp, rnn_hxs


def _reference_act(fused, inputs):
    """Pure-JAX reference using the same fused bf16 weights / f32 accumulation."""
    x = inputs.astype(fused["w1"].dtype)
    h2w = fused["w1"].shape[1]
    b1 = fused["biases"][0:1, :h2w]
    b2 = fused["biases"][1:2, :h2w]
    bh = fused["biases"][2:3, :fused["wh"].shape[1]]

    h1 = jnp.maximum(
        jnp.dot(x, fused["w1"], preferred_element_type=jnp.float32) + b1, 0.0)
    h2 = jnp.maximum(
        jnp.dot(h1.astype(fused["w2"].dtype), fused["w2"],
                preferred_element_type=jnp.float32) + b2, 0.0)
    head = jnp.dot(h2.astype(fused["wh"].dtype), fused["wh"],
                   preferred_element_type=jnp.float32) + bh
    value = head[:, 0:1]
    logits = head[:, 1:]
    logp_all = jax.nn.log_softmax(logits, axis=-1)
    action = jnp.argmax(logits, axis=-1, keepdims=True)
    alp = jnp.take_along_axis(logp_all, action, axis=-1)
    return value, action.astype(jnp.int32), alp


if __name__ == "__main__":
    batch = 8
    num_inputs = 16      # obs_space.shape[0]
    hidden_size = 64     # MLPBase default
    num_actions = 8      # action_space.n

    root = jax.random.PRNGKey(0)
    k_x, k_p = jax.random.split(root)
    inputs = jax.random.normal(k_x, (batch, num_inputs), jnp.float32)
    rnn_hxs = jnp.zeros((batch, 1), jnp.float32)   # recurrent_hidden_state_size == 1
    masks = jnp.ones((batch, 1), jnp.float32)

    params = make_policy_params(num_inputs, hidden_size, num_actions, k_p)
    fused = fuse_policy_params(params, compute_dtype=jnp.bfloat16)

    value, action, logp, rnn_hxs_out = policy_act(fused, inputs, rnn_hxs, masks)
    jax.block_until_ready((value, action, logp, rnn_hxs_out))

    # sanity check against a pure-JAX reference with the same fused weights
    v_ref, a_ref, lp_ref = _reference_act(fused, inputs)
    assert value.shape == (batch, 1) and action.shape == (batch, 1)
    assert logp.shape == (batch, 1) and rnn_hxs_out.shape == rnn_hxs.shape
    assert jnp.allclose(value, v_ref, atol=1e-3), "value mismatch"
    assert jnp.array_equal(action, a_ref), "action mismatch"
    assert jnp.allclose(logp, lp_ref, atol=1e-3), "log-prob mismatch"

    print("KERNEL_OK")
</pallas_src>

<mosaic_0001>
module attributes {stable_mosaic.version = 11 : i64} {
  func.func @_policy_kernel(%arg0: i32, %arg1: memref<8x16xf32, #tpu.memory_space<vmem>>, %arg2: memref<16x128xbf16, #tpu.memory_space<vmem>>, %arg3: memref<128x128xbf16, #tpu.memory_space<vmem>>, %arg4: memref<128x9xbf16, #tpu.memory_space<vmem>>, %arg5: memref<3x128xf32, #tpu.memory_space<vmem>>, %arg6: memref<8x8xf32, #tpu.memory_space<vmem>>) attributes {dimension_semantics = [#tpu.dimension_semantics<parallel>], iteration_bounds = array<i64: 1>, scalar_prefetch = 0 : i64, scratch_operands = 0 : i64, tpu.core_type = #tpu.core_type<tc>, window_params = [{transform_indices = @transform_0, window_bounds = array<i64: 8, 16>}, {pipeline_mode = #tpu.pipeline_mode<synchronous>, transform_indices = @transform_1, window_bounds = array<i64: 16, 128>}, {pipeline_mode = #tpu.pipeline_mode<synchronous>, transform_indices = @transform_2, window_bounds = array<i64: 128, 128>}, {pipeline_mode = #tpu.pipeline_mode<synchronous>, transform_indices = @transform_3, window_bounds = array<i64: 128, 9>}, {pipeline_mode = #tpu.pipeline_mode<synchronous>, transform_indices = @transform_4, window_bounds = array<i64: 3, 128>}, {transform_indices = @transform_5, window_bounds = array<i64: 8, 8>}]} {
    %c0 = arith.constant 0 : index
    %c0_0 = arith.constant 0 : index
    %0 = vector.load %arg1[%c0, %c0_0] : memref<8x16xf32, #tpu.memory_space<vmem>>, vector<8x16xf32>
    %1 = arith.truncf %0 : vector<8x16xf32> to vector<8x16xbf16>
    %c0_1 = arith.constant 0 : index
    %c0_2 = arith.constant 0 : index
    %2 = vector.load %arg5[%c0_1, %c0_2] : memref<3x128xf32, #tpu.memory_space<vmem>>, vector<1x128xf32>
    %c1 = arith.constant 1 : index
    %c0_3 = arith.constant 0 : index
    %3 = vector.load %arg5[%c1, %c0_3] : memref<3x128xf32, #tpu.memory_space<vmem>>, vector<1x128xf32>
    %c2 = arith.constant 2 : index
    %c0_4 = arith.constant 0 : index
    %4 = vector.load %arg5[%c2, %c0_4] : memref<3x128xf32, #tpu.memory_space<vmem>>, vector<1x9xf32>
    %c0_5 = arith.constant 0 : index
    %c0_6 = arith.constant 0 : index
    %5 = vector.load %arg2[%c0_5, %c0_6] : memref<16x128xbf16, #tpu.memory_space<vmem>>, vector<16x128xbf16>
    %cst = arith.constant dense<0.000000e+00> : vector<8x128xf32>
    %6 = tpu.matmul %1, %5, %cst {dimension_numbers = #tpu.dot_dimension_numbers<[1], [0], [0], [1], [0, 0, 1, 1], [], []>} : vector<8x16xbf16>, vector<16x128xbf16>, vector<8x128xf32> -> vector<8x128xf32>
    %7 = vector.broadcast %2 : vector<1x128xf32> to vector<8x128xf32>
    %8 = arith.addf %6, %7 : vector<8x128xf32>
    %cst_7 = arith.constant 0.000000e+00 : f32
    %9 = vector.broadcast %cst_7 : f32 to vector<8x128xf32>
    %10 = arith.maximumf %8, %9 : vector<8x128xf32>
    %11 = arith.truncf %10 : vector<8x128xf32> to vector<8x128xbf16>
    %c0_8 = arith.constant 0 : index
    %c0_9 = arith.constant 0 : index
    %12 = vector.load %arg3[%c0_8, %c0_9] : memref<128x128xbf16, #tpu.memory_space<vmem>>, vector<128x128xbf16>
    %cst_10 = arith.constant dense<0.000000e+00> : vector<8x128xf32>
    %13 = tpu.matmul %11, %12, %cst_10 {dimension_numbers = #tpu.dot_dimension_numbers<[1], [0], [0], [1], [0, 0, 1, 1], [], []>} : vector<8x128xbf16>, vector<128x128xbf16>, vector<8x128xf32> -> vector<8x128xf32>
    %14 = vector.broadcast %3 : vector<1x128xf32> to vector<8x128xf32>
    %15 = arith.addf %13, %14 : vector<8x128xf32>
    %cst_11 = arith.constant 0.000000e+00 : f32
    %16 = vector.broadcast %cst_11 : f32 to vector<8x128xf32>
    %17 = arith.maximumf %15, %16 : vector<8x128xf32>
    %18 = arith.truncf %17 : vector<8x128xf32> to vector<8x128xbf16>
    %c0_12 = arith.constant 0 : index
    %c0_13 = arith.constant 0 : index
    %19 = vector.load %arg4[%c0_12, %c0_13] : memref<128x9xbf16, #tpu.memory_space<vmem>>, vector<128x9xbf16>
    %cst_14 = arith.constant dense<0.000000e+00> : vector<8x9xf32>
    %20 = tpu.matmul %18, %19, %cst_14 {dimension_numbers = #tpu.dot_dimension_numbers<[1], [0], [0], [1], [0, 0, 1, 1], [], []>} : vector<8x128xbf16>, vector<128x9xbf16>, vector<8x9xf32> -> vector<8x9xf32>
    %21 = vector.broadcast %4 : vector<1x9xf32> to vector<8x9xf32>
    %22 = arith.addf %20, %21 : vector<8x9xf32>
    %23 = vector.extract_strided_slice %22 {offsets = [0, 0], sizes = [8, 1], strides = [1, 1]} : vector<8x9xf32> to vector<8x1xf32>
    %24 = vector.extract_strided_slice %22 {offsets = [0, 1], sizes = [8, 8], strides = [1, 1]} : vector<8x9xf32> to vector<8x8xf32>
    %cst_15 = arith.constant dense<0xFF800000> : vector<8xf32>
    %25 = vector.multi_reduction <maximumf>, %24, %cst_15 [1] : vector<8x8xf32> to vector<8xf32>
    %26 = vector.shape_cast %25 : vector<8xf32> to vector<8x1xf32>
    %27 = vector.broadcast %26 : vector<8x1xf32> to vector<8x8xf32>
    %28 = arith.subf %24, %27 : vector<8x8xf32>
    %29 = math.exp %28 : vector<8x8xf32>
    %cst_16 = arith.constant dense<0.000000e+00> : vector<8xf32>
    %30 = vector.multi_reduction <add>, %29, %cst_16 [1] : vector<8x8xf32> to vector<8xf32>
    %31 = vector.shape_cast %30 : vector<8xf32> to vector<8x1xf32>
    %32 = math.log %31 : vector<8x1xf32>
    %cst_17 = arith.constant 0.000000e+00 : f32
    %33 = vector.broadcast %cst_17 : f32 to vector<8x1xf32>
    %34 = arith.subf %33, %32 : vector<8x1xf32>
    %35 = tpu.iota {dimensions = array<i32: 1>} : vector<8x8xi32>
    %36 = vector.broadcast %26 : vector<8x1xf32> to vector<8x8xf32>
    %37 = arith.cmpf oeq, %24, %36 : vector<8x8xf32>
    %c8_i32 = arith.constant 8 : i32
    %38 = vector.broadcast %c8_i32 : i32 to vector<8x8xi32>
    %39 = arith.select %37, %35, %38 : vector<8x8xi1>, vector<8x8xi32>
    %cst_18 = arith.constant dense<2147483647> : vector<8xi32>
    %40 = vector.multi_reduction <minsi>, %39, %cst_18 [1] : vector<8x8xi32> to vector<8xi32>
    %41 = vector.shape_cast %40 : vector<8xi32> to vector<8x1xi32>
    %c7_i32 = arith.constant 7 : i32
    %42 = vector.broadcast %c7_i32 : i32 to vector<8x1xi32>
    %43 = arith.minsi %41, %42 : vector<8x1xi32>
    %44 = arith.sitofp %43 : vector<8x1xi32> to vector<8x1xf32>
    %45 = tpu.iota {dimensions = array<i32: 1>} : vector<8x8xi32>
    %c0_i32 = arith.constant 0 : i32
    %46 = vector.broadcast %c0_i32 : i32 to vector<8x8xi32>
    %47 = arith.cmpi eq, %45, %46 : vector<8x8xi32>
    %c1_i32 = arith.constant 1 : i32
    %48 = vector.broadcast %c1_i32 : i32 to vector<8x8xi32>
    %49 = arith.cmpi eq, %45, %48 : vector<8x8xi32>
    %c2_i32 = arith.constant 2 : i32
    %50 = vector.broadcast %c2_i32 : i32 to vector<8x8xi32>
    %51 = arith.cmpi eq, %45, %50 : vector<8x8xi32>
    %cst_19 = arith.constant 0.000000e+00 : f32
    %52 = vector.shape_cast %44 : vector<8x1xf32> to vector<8x1xf32>
    %53 = vector.broadcast %52 : vector<8x1xf32> to vector<8x8xf32>
    %54 = vector.broadcast %cst_19 : f32 to vector<8x8xf32>
    %55 = arith.select %51, %53, %54 : vector<8x8xi1>, vector<8x8xf32>
    %56 = vector.shape_cast %34 : vector<8x1xf32> to vector<8x1xf32>
    %57 = vector.broadcast %56 : vector<8x1xf32> to vector<8x8xf32>
    %58 = arith.select %49, %57, %55 : vector<8x8xi1>, vector<8x8xf32>
    %59 = vector.shape_cast %23 : vector<8x1xf32> to vector<8x1xf32>
    %60 = vector.broadcast %59 : vector<8x1xf32> to vector<8x8xf32>
    %61 = arith.select %47, %60, %58 : vector<8x8xi1>, vector<8x8xf32>
    %c0_20 = arith.constant 0 : index
    %c0_21 = arith.constant 0 : index
    %62 = vector.load %arg6[%c0_20, %c0_21] : memref<8x8xf32, #tpu.memory_space<vmem>>, vector<8x8xf32>
    tpu.vector_store %arg6[%c0_20, %c0_21], %61 {strides = array<i32>} : memref<8x8xf32, #tpu.memory_space<vmem>>, vector<8x8xf32>,
    return
  }
  func.func @transform_0(%arg0: i32) -> (i32, i32) {
    %c0_i32 = arith.constant 0 : i32
    %c0_i32_0 = arith.constant 0 : i32
    return %arg0, %c0_i32 : i32, i32
  }
  func.func @transform_1(%arg0: i32) -> (i32, i32) {
    %c0_i32 = arith.constant 0 : i32
    %c0_i32_0 = arith.constant 0 : i32
    %c0_i32_1 = arith.constant 0 : i32
    return %c0_i32, %c0_i32_0 : i32, i32
  }
  func.func @transform_2(%arg0: i32) -> (i32, i32) {
    %c0_i32 = arith.constant 0 : i32
    %c0_i32_0 = arith.constant 0 : i32
    %c0_i32_1 = arith.constant 0 : i32
    return %c0_i32, %c0_i32_0 : i32, i32
  }
  func.func @transform_3(%arg0: i32) -> (i32, i32) {
    %c0_i32 = arith.constant 0 : i32
    %c0_i32_0 = arith.constant 0 : i32
    %c0_i32_1 = arith.constant 0 : i32
    return %c0_i32, %c0_i32_0 : i32, i32
  }
  func.func @transform_4(%arg0: i32) -> (i32, i32) {
    %c0_i32 = arith.constant 0 : i32
    %c0_i32_0 = arith.constant 0 : i32
    %c0_i32_1 = arith.constant 0 : i32
    return %c0_i32, %c0_i32_0 : i32, i32
  }
  func.func @transform_5(%arg0: i32) -> (i32, i32) {
    %c0_i32 = arith.constant 0 : i32
    %c0_i32_0 = arith.constant 0 : i32
    return %arg0, %c0_i32 : i32, i32
  }
}

</mosaic_0001>

<bundles_post_ra>
// kernel: policy_act.1
= control target key start
LH: loop header
LB: loop body
LE: loop exit
PB: predicated region body
PF: predicated region fallthrough
CT: control target
= control target key end

     0   :  { %10 = vsyncpa [#allocation3], 0  ;;  %s516_s18 = smov [#allocation2]   ;;  %s651_s0 = inlined_call_operand.vmem [shape: f32[8,16], index: 0, kind: input, shape index: {}]   ;;  %s652_s1 = inlined_call_operand.hbm [shape: bf16[16,128], index: 1, kind: input, shape index: {}]   ;;  %s653_s2 = inlined_call_operand.vmem [shape: bf16[128,128], index: 2, kind: input, shape index: {}]   ;;  %s654_s3 = inlined_call_operand.vmem [shape: bf16[128,9], index: 3, kind: input, shape index: {}]   ;;  %s655_s4 = inlined_call_operand.vmem [shape: f32[3,128], index: 4, kind: input, shape index: {}]   ;;  %s656_s5 = inlined_call_operand.vmem [shape: f32[8,8], index: 5, kind: output, shape index: {}]  }
   0x1   :  { %s18_s19 = sshll.u32 %s516_s18, 4  ;;  %s492_s22 = scalar_lea.hbm %s652_s1, 128  ;;  %s19_s19 = int_to_ptr.vmem [resolvable:$true] %s18_s19 }
   0x2   :  { %p493_p0 = scmp.ne.s32.totalorder %s652_s1, %s492_s22  ;;  %p496_p1 = scmp.lt.u32.totalorder %s492_s22, %s652_s1 }
   0x4   :  { %p498_p2 = pnand %p496_p1, %p493_p0 }
   0x6   :  { %501 = shalt.err (!%p498_p2)
}
   0x7   :  { %s502_s27 = scalar_lea.vmem %s19_s19, 128  ;;  %p507_p4 = scmp.lt.s32.totalorder %s19_s19, %s19_s19 }
   0x8   :  { %p503_p3 = scmp.ne.s32.totalorder %s19_s19, %s502_s27  ;;  %p508_p5 = scmp.lt.s32.totalorder %s502_s27, %s502_s27 }
   0xa   :  { %p509_p6 = por %p508_p5, %p507_p4 }
   0xc   :  { %p510_p7 = pnand %p509_p6, %p503_p3 }
   0xe   :  { %513 = shalt.err (!%p510_p7)
}
   0xf   :  { %s517_s28 = smov 64   ;;  %s518_s29 = smov 4  }
  0x10   :  { %24 = dma.hbm_to_vmem [thread:$0]  %s652_s1, 128, %s19_s19, [#allocation3], %s517_s28, %s517_s28, %s518_s29  }
  0x11   :  { %514 = dma.done.wait [#allocation3], 128  }
  0x12   :  { %515 = vsyncadd [#allocation3], 4294967168  ;;  %v519_v0 = vmov 0.0   ;;  %vm520_vm0 = vmmov 0   ;;  %v471_v1 = vld [vmem:[#allocation2] sm:$0xff]   ;;  %vm52_vm1 = vcmask 130048   ;;  %v334_v43 = vlaneseq }
  0x13   :  { %416 = vmatprep.subr.bf16.mxu0 %v519_v0  ;;  %418 = vmatprep.mubr.msk.bf16.mxu0 %vm520_vm0, %v519_v0  ;;  %v35_v2 = vld [vmem:[%s651_s0] sm:$0xff]  ;;  %v473_v5 = vld [vmem:[%s653_s2 + $0x8] sm:$0xff]   ;;  %v474_v6 = vld [vmem:[%s653_s2 + $0x10] sm:$0xff]   ;;  %vm316_vm2 = vcmask 72712   ;;  %v523_v54 = vmov 0   ;;  %vm327_vm5 = vcmask 64512  }
  0x14   :  { %422 = vmatprep.subr.bf16.mxu1 %v519_v0  ;;  %438 = vmatprep.mubr.msk.bf16.mxu1 %vm520_vm0, %v519_v0  ;;  %v36_v3 = vpack.c.bf16 %v35_v2, %v35_v2  ;;  %v472_v4 = vld [vmem:[%s653_s2] sm:$0xff]   ;;  %v475_v7 = vld [vmem:[%s653_s2 + $0x18] sm:$0xff]   ;;  %v477_v9 = vld [vmem:[%s653_s2 + $0x28] sm:$0xff]   ;;  %v335_v44 = vand.u32 127, %v334_v43 }
  0x15   :  { %417 = vmatpush3.bf16.msra.mxu0 %v471_v1  ;;  %423 = vmatpush3.bf16.msra.mxu1 %v472_v4  ;;  %v476_v8 = vld [vmem:[%s653_s2 + $0x20] sm:$0xff]   ;;  %v478_v10 = vld [vmem:[%s653_s2 + $0x30] sm:$0xff]   ;;  %v479_v11 = vld [vmem:[%s653_s2 + $0x38] sm:$0xff]  }
  0x16   :  { %442 = vmatprep.subr.bf16.mxu0 %v519_v0  ;;  %424 = vmatprep.subr.bf16.mxu1 %v519_v0  ;;  %v480_v12 = vld [vmem:[%s654_s3] sm:$0xff]   ;;  %v481_v13 = vld [vmem:[%s654_s3 + $0x8] sm:$0xff]   ;;  %v482_v14 = vld [vmem:[%s654_s3 + $0x10] sm:$0xff]   ;;  %vm360_vm7 = vcmp.eq.s32.totalorder %v335_v44, 2  ;;  %vm359_vm8 = vcmp.eq.s32.totalorder %v335_v44, 1  ;;  %vm358_vm9 = vcmp.eq.s32.totalorder %v335_v44, 0 }
  0x17   :  { %v483_v15 = vld [vmem:[%s654_s3 + $0x18] sm:$0xff]   ;;  %v484_v16 = vld [vmem:[%s654_s3 + $0x20] sm:$0xff]   ;;  %v485_v17 = vld [vmem:[%s654_s3 + $0x28] sm:$0xff]   ;;  %470 = vset.pattern.permute.xlu0 %v523_v54 }
  0x18   :  { %419 = vmatmul.mubr.msk.bf16.vlgmr.msra.gmra.mrb[0].mxu0 %vm52_vm1, %v36_v3  ;;  %v375_v18 = vld [vmem:[%s655_s4] ss:$0 sm:$0xff]  ;;  %v486_v26 = vld [vmem:[%s654_s3 + $0x30] sm:$0xff]   ;;  %v487_v27 = vld [vmem:[%s654_s3 + $0x38] sm:$0xff]   ;;  %s521_s3 = smov 1  }
  0x19   :  { %458 = vmatprep.mubr.msk.bf16.mxu0 %vm520_vm0, %v519_v0  ;;  %425 = vmatpush3.bf16.msra.mxu1 %v473_v5  ;;  %v378_v28 = vld [vmem:[%s655_s4 + $0x1] ss:$0 sm:$0xff]  ;;  %v387_v36 = vld [vmem:[%s655_s4 + $0x2] ss:$0 sm:$0xff]  ;;  %s522_s4 = smov 127  }
  0x1a   :  { %426 = vmatprep.subr.bf16.mxu1 %v519_v0  ;;  %443 = vmatpush3.bf16.msra.mxu0 %v480_v12 }
  0x1b   :  { %444 = vmatprep.subr.bf16.mxu0 %v519_v0 }
  0x1d   :  { %427 = vmatpush3.bf16.msra.mxu1 %v474_v6 }
  0x1e   :  { %428 = vmatprep.subr.bf16.mxu1 %v519_v0  ;;  %445 = vmatpush3.bf16.msra.mxu0 %v481_v13 }
  0x1f   :  { %446 = vmatprep.subr.bf16.mxu0 %v519_v0 }
  0x21   :  { %429 = vmatpush3.bf16.msra.mxu1 %v475_v7 }
  0x22   :  { %430 = vmatprep.subr.bf16.mxu1 %v519_v0  ;;  %447 = vmatpush3.bf16.msra.mxu0 %v482_v14 }
  0x23   :  { %448 = vmatprep.subr.bf16.mxu0 %v519_v0 }
  0x25   :  { %431 = vmatpush3.bf16.msra.mxu1 %v476_v8 }
  0x26   :  { %432 = vmatprep.subr.bf16.mxu1 %v519_v0  ;;  %449 = vmatpush3.bf16.msra.mxu0 %v483_v15 }
  0x27   :  { %450 = vmatprep.subr.bf16.mxu0 %v519_v0 }
  0x29   :  { %433 = vmatpush3.bf16.msra.mxu1 %v477_v9 }
  0x2a   :  { %434 = vmatprep.subr.bf16.mxu1 %v519_v0  ;;  %451 = vmatpush3.bf16.msra.mxu0 %v484_v16 }
  0x2b   :  { %452 = vmatprep.subr.bf16.mxu0 %v519_v0 }
  0x2d   :  { %435 = vmatpush3.bf16.msra.mxu1 %v478_v10 }
  0x2e   :  { %436 = vmatprep.subr.bf16.mxu1 %v519_v0  ;;  %453 = vmatpush3.bf16.msra.mxu0 %v485_v17 }
  0x2f   :  { %454 = vmatprep.subr.bf16.mxu0 %v519_v0 }
  0x31   :  { %437 = vmatpush3.bf16.msra.mxu1 %v479_v11 }
  0x32   :  { %455 = vmatpush3.bf16.msra.mxu0 %v486_v26 }
  0x33   :  { %456 = vmatprep.subr.bf16.mxu0 %v519_v0 }
  0x36   :  { %457 = vmatpush3.bf16.msra.mxu0 %v487_v27 }
  0xeb   :  { %v90_v19 = vpop.f32.mrb[0].mxu0 }
  0xec   :  { %v91_v20 = vadd.f32 %v375_v18, %v90_v19  ;;  %v420_v21 = vpop.f32.mrb[1].mxu0 }
  0xed   :  { %v93_v22 = vpop.f32.mrb[2].mxu0 }
  0xee   :  { %v96_v23 = vmax.f32 %v91_v20, 0.0  ;;  %v421_v24 = vpop.f32.mrb[3].mxu0 }
  0xf0   :  { %v97_v25 = vpack.c.bf16 %v96_v23, %v96_v23 }
  0xf2   :  { %439 = vmatmul.mubr.bf16.vlgmr.msra.gmra.mrb[0].mxu1 %v97_v25 }
 0x1c5   :  { %v200_v29 = vpop.f32.mrb[0].mxu1 }
 0x1c6   :  { %v201_v30 = vadd.f32 %v378_v28, %v200_v29  ;;  %v440_v31 = vpop.f32.mrb[1].mxu1 }
 0x1c7   :  { %v203_v32 = vpop.f32.mrb[2].mxu1 }
 0x1c8   :  { %v206_v33 = vmax.f32 %v201_v30, 0.0  ;;  %v441_v34 = vpop.f32.mrb[3].mxu1 }
 0x1ca   :  { %v207_v35 = vpack.c.bf16 %v206_v33, %v206_v33 }
 0x1cc   :  { %459 = vmatmul.mubr.bf16.vlgmr.msra.gmra.mrb[4].mxu0 %v207_v35 }
 0x29f   :  { %v310_v37 = vpop.f32.mrb[4].mxu0 }
 0x2a0   :  { %v311_v38 = vadd.f32 %v387_v36, %v310_v37  ;;  %v460_v39 = vpop.f32.mrb[5].mxu0 }
 0x2a1   :  { %v313_v40 = vpop.f32.mrb[6].mxu0 }
 0x2a2   :  { %v461_v41 = vpop.f32.mrb[7].mxu0  ;;  %v317_v42 = vsel %vm316_vm2, %v311_v38, -inf }
 0x2a3   :  { %318 = vmax.xlane.f32.xlu0 %v317_v42 }
 0x2b9   :  { %337 = vrot.lane.b32.xlu0 %v335_v44, %s521_s3 }
 0x330   :  { %v319_v45 = vpop.xlane.xlu0 %318 }
 0x331   :  { %vm336_vm3 = vcmp.eq.f32.partialorder %v311_v38, %v319_v45  ;;  %v320_v50 = vsub.f32 %v311_v38, %v319_v45 }
 0x333   :  { %v321_v52 = vmul.f32 1.442695, %v320_v50 }
 0x334   :  { %v338_v46 = vpop.permute.xlu0 %337 }
 0x335   :  { %v339_v47 = vsel %vm336_vm3, %v338_v46, 8  ;;  %488 = vpow2.f32 %v321_v52 }
 0x336   :  { %v340_v48 = vsel %vm316_vm2, %v339_v47, 2147483647 }
 0x337   :  { %v342_v49 = vshra.s32 %v340_v48, 16  ;;  %v341_v55 = vand.u32 65535, %v340_v48 }
 0x339   :  { %v344_v51 = vcvt.s32.f32 %v342_v49  ;;  %v343_v57 = vcvt.s32.f32 %v341_v55 }
 0x33b   :  { %345 = vmin.xlane.f32.xlu1 %v344_v51 }
 0x33f   :  { %v489_v53 = vpop.eup %488 }
 0x34c   :  { %324 = vrot.lane.b32.xlu1 %v489_v53, %s522_s4 }
 0x3c8   :  { %v346_v56 = vpop.xlane.xlu1 %345 }
 0x3c9   :  { %vm347_vm4 = vcmp.eq.f32.partialorder %v344_v51, %v346_v56  ;;  %v352_v61 = vcvt.f32.s32 %v346_v56 }
 0x3ca   :  { %v348_v58 = vsel %vm347_vm4, %v343_v57, inf }
 0x3cb   :  { %349 = vmin.xlane.f32.xlu0 %v348_v58  ;;  %v353_v0 = vshll.u32 %v352_v61, 16 }
 0x3cc   :  { %v325_v59 = vpop.permute.xlu1 %324 }
 0x3cd   :  { %v328_v60 = vsel %vm327_vm5, %v325_v59, 0.0 }
 0x3ce   :  { %329 = vadd.xlane.f32.xlu1 %v328_v60 }
 0x3e1   :  { %365 = vperm.xlu0 %470, %v311_v38  }
 0x458   :  { %v350_v62 = vpop.xlane.xlu0 %349 }
 0x459   :  { %v351_v63 = vcvt.f32.s32 %v350_v62 }
 0x45b   :  { %v330_v1 = vpop.xlane.xlu1 %329  ;;  %v354_v2 = vadd.s32 %v353_v0, %v351_v63 }
 0x45c   :  { %490 = vlog2.f32 %v330_v1 }
 0x45d   :  { %vm355_vm6 = vcmp.lt.s32.totalorder %v354_v2, 7 }
 0x45e   :  { %v356_v3 = vsel %vm355_vm6, %v354_v2, 7 }
 0x45f   :  { %v357_v5 = vcvt.s32.f32 %v356_v3 }
 0x460   :  { %v366_v10 = vpop.permute.xlu0 %365 }
 0x461   :  { %v361_v8 = vsel %vm360_vm7, %v357_v5, 0.0 }
 0x466   :  { %v491_v4 = vpop.eup %490 }
 0x467   :  { %v332_v6 = vmul.f32 0.6931472, %v491_v4 }
 0x469   :  { %v333_v7 = vsub.f32 0.0, %v332_v6 }
 0x46b   :  { %v362_v9 = vsel %vm359_vm8, %v333_v7, %v361_v8 }
 0x46c   :  { %v368_v11 = vsel %vm358_vm9, %v366_v10, %v362_v9 }
 0x46d   :  { %369 = vst.msk [vmem:[%s656_s5] sm:$0xff] %vm327_vm5, %v368_v11 }
 0x46e   :  { %374 = vsyncpa [#allocation3], 1 }

</bundles_post_ra>
